<compile_context>
chip_gen: v5e
topology: v5e:2x2
jax: 0.10.0
libtpu: 0.0.40
codegen_flags: <defaults>
</compile_context>

<pallas_src>
import jax
import jax.numpy as jnp
import numpy as np
from jax.experimental import pallas as pl
from jax.experimental.pallas import tpu as pltpu


def _ceil_to(x, m):
    return -(-x // m) * m


def _attention_kernel(x_ref, w_ref, o_ref):
    # x_ref: (BT, S, Hp)   w_ref: (Hp, 1)   o_ref: (BT, Hp)
    bt, s, hp = x_ref.shape
    x = x_ref[...]                                        # (BT, S, Hp)

    # scores = relu(x @ w)
    if s % 8 == 0:
        # Single flat MXU matmul (M=BT*S, K=Hp, N=1).  The reshapes merge /
        # split the sublane dim at an 8-aligned boundary, so they are
        # layout-free.  HIGHEST precision keeps the f32 accuracy needed for
        # the 1e-5 tolerance; the extra MXU passes are hidden under HBM.
        scores = jnp.dot(x.reshape(bt * s, hp), w_ref[...],
                         precision=jax.lax.Precision.HIGHEST,
                         preferred_element_type=jnp.float32)   # (BT*S, 1)
        scores = scores.reshape(bt, s, 1)                      # (BT, S, 1)
    else:
        # Fallback (non-8-aligned S): VPU multiply + lane reduce, keepdims so
        # S still lands in the sublane position.
        w_row = jnp.reshape(w_ref[...], (1, 1, hp))
        scores = jnp.sum(x * w_row, axis=-1, keepdims=True)    # (BT, S, 1)
    scores = jnp.maximum(scores, 0.0)                          # relu

    # softmax over the sequence axis; S stays in sublanes (axis=1 reductions),
    # normalization deferred to a single reciprocal-multiply at the end.
    m = jnp.max(scores, axis=1, keepdims=True)                 # (BT, 1, 1)
    e = jnp.exp(scores - m)                                    # (BT, S, 1)
    denom = jnp.sum(e, axis=1, keepdims=True)                  # (BT, 1, 1)

    # attention-weighted sum over S: e broadcasts along the lane axis (no
    # relayout).  The (BT, S, Hp) product temporary is budgeted for in the
    # wrapper's vmem_limit_bytes.
    weighted = jnp.sum(e * x, axis=1)                          # (BT, Hp)

    inv = pl.reciprocal(denom, approx=False)                   # exact: 1e-5 tol
    o_ref[...] = weighted * inv[:, 0, :]                       # (BT, Hp)


def attention_forward(inputs, att_weights, *, target_tile_bytes=4 << 20):
    """inputs: (B, S, H) f32, att_weights: (1, H) f32 -> (B, H) f32."""
    inputs = inputs.astype(jnp.float32)
    att_weights = att_weights.astype(jnp.float32)
    B, S, H = inputs.shape

    # Pad hidden to a lane-dense multiple of 128; zero columns contribute
    # nothing to either the score matmul or the weighted sum.
    Hp = _ceil_to(H, 128)
    x = inputs
    w = att_weights
    if Hp != H:
        x = jnp.pad(x, ((0, 0), (0, 0), (0, Hp - H)))
        w = jnp.pad(w, ((0, 0), (0, Hp - H)))
    w_col = jnp.transpose(w)                       # (Hp, 1): MXU-ready column

    # ---- batch tiling ----------------------------------------------------
    row_bytes = S * Hp * 4
    bt_cap = max(1, target_tile_bytes // row_bytes)     # rows per ~4 MiB tile
    if B <= 8:
        # Tiny batch: one step covering the whole batch.  Block == full array
        # dims (no (8,128) issue) and no all-padding ghost step burning HBM
        # bandwidth on single-TensorCore chips.
        BT = B
    else:
        bt_budget = max(8, (bt_cap // 8) * 8)
        # At least 2 grid steps, and an even count, so v7x's two TensorCores
        # are both fed and DMA/compute overlap is preserved.
        n_steps = max(2, -(-B // bt_budget))
        if n_steps % 2:
            n_steps += 1
        BT = max(8, _ceil_to(-(-B // n_steps), 8))       # multiple of 8 <= budget
    Bp = _ceil_to(B, BT)
    if Bp != B:
        # Zero batch rows are harmless: relu(0)=0 -> uniform softmax -> 0 out.
        x = jnp.pad(x, ((0, Bp - B), (0, 0), (0, 0)))

    # ---- VMEM budget -------------------------------------------------------
    in_tile = BT * S * Hp * 4
    out_tile = BT * Hp * 4
    # 2x double-buffered input + output, one input-tile-sized e*x temporary,
    # plus slack for scores/e/weights/internal scratch.
    need = 3 * in_tile + 2 * out_tile + (1 << 20)
    vmem_limit = int(min(max(need, 8 << 20), 64 << 20))

    out = pl.pallas_call(
        _attention_kernel,
        out_shape=jax.ShapeDtypeStruct((Bp, Hp), jnp.float32),
        grid_spec=pltpu.PrefetchScalarGridSpec(
            num_scalar_prefetch=0,
            grid=(Bp // BT,),
            in_specs=[
                pl.BlockSpec((BT, S, Hp), lambda b: (b, 0, 0)),
                # constant index_map: weight column stays resident in VMEM
                pl.BlockSpec((Hp, 1), lambda b: (0, 0)),
            ],
            out_specs=pl.BlockSpec((BT, Hp), lambda b: (b, 0)),
        ),
        compiler_params=pltpu.CompilerParams(
            dimension_semantics=("parallel",),
            vmem_limit_bytes=vmem_limit),
    )(x, w_col)

    if Bp != B or Hp != H:
        out = out[:B, :H]
    return out


def reference_forward(inputs, att_weights):
    """Pure-JAX reference mirroring the PyTorch forward (B > 1 path)."""
    B = inputs.shape[0]
    w = jnp.transpose(att_weights)[None].repeat(B, axis=0)          # (B, H, 1)
    weights = jnp.einsum("bsh,bhk->bsk", inputs, w,
                         precision="highest")                       # (B, S, 1)
    scores = jnp.maximum(jnp.squeeze(weights, -1), 0.0)             # (B, S)
    attn = jax.nn.softmax(scores, axis=-1)
    attn = attn / jnp.sum(attn, axis=-1, keepdims=True)             # redundant renorm
    weighted = inputs * attn[..., None]
    return jnp.sum(weighted, axis=1)


if __name__ == "__main__":
    B, S, H = 2, 8, 32
    key = jax.random.PRNGKey(0)
    k_x, k_w = jax.random.split(key)

    # deterministic parameter init matching nn.init.uniform_(-stdv, stdv)
    stdv = 1.0 / np.sqrt(H)
    att_weights = jax.random.uniform(
        k_w, (1, H), dtype=jnp.float32, minval=-stdv, maxval=stdv)

    inputs = jax.random.normal(k_x, (B, S, H), dtype=jnp.float32)

    out = attention_forward(inputs, att_weights)
    out = jax.block_until_ready(out)

    ref = reference_forward(inputs, att_weights)
    np.testing.assert_allclose(np.asarray(out), np.asarray(ref),
                               rtol=1e-5, atol=1e-5)

    print("KERNEL_OK")
</pallas_src>

<mosaic_0001>
module attributes {stable_mosaic.version = 11 : i64} {
  func.func @_attention_kernel(%arg0: i32, %arg1: memref<2x8x128xf32, #tpu.memory_space<vmem>>, %arg2: memref<128x1xf32, #tpu.memory_space<vmem>>, %arg3: memref<2x128xf32, #tpu.memory_space<vmem>>) attributes {dimension_semantics = [#tpu.dimension_semantics<parallel>], iteration_bounds = array<i64: 1>, scalar_prefetch = 0 : i64, scratch_operands = 0 : i64, tpu.core_type = #tpu.core_type<tc>, window_params = [{transform_indices = @transform_0, window_bounds = array<i64: 2, 8, 128>}, {pipeline_mode = #tpu.pipeline_mode<synchronous>, transform_indices = @transform_1, window_bounds = array<i64: 128, 1>}, {transform_indices = @transform_2, window_bounds = array<i64: 2, 128>}]} {
    %c0 = arith.constant 0 : index
    %c0_0 = arith.constant 0 : index
    %c0_1 = arith.constant 0 : index
    %0 = vector.load %arg1[%c0, %c0_0, %c0_1] : memref<2x8x128xf32, #tpu.memory_space<vmem>>, vector<2x8x128xf32>
    %1 = vector.shape_cast %0 : vector<2x8x128xf32> to vector<16x128xf32>
    %c0_2 = arith.constant 0 : index
    %c0_3 = arith.constant 0 : index
    %2 = vector.load %arg2[%c0_2, %c0_3] : memref<128x1xf32, #tpu.memory_space<vmem>>, vector<128x1xf32>
    %cst = arith.constant dense<0.000000e+00> : vector<16x1xf32>
    %3 = tpu.matmul %1, %2, %cst {dimension_numbers = #tpu.dot_dimension_numbers<[1], [0], [0], [1], [0, 0, 1, 1], [], []>, precision = #tpu.contract_precision<fp32>} : vector<16x128xf32>, vector<128x1xf32>, vector<16x1xf32> -> vector<16x1xf32>
    %4 = vector.shape_cast %3 : vector<16x1xf32> to vector<2x8x1xf32>
    %cst_4 = arith.constant 0.000000e+00 : f32
    %5 = vector.broadcast %cst_4 : f32 to vector<2x8x1xf32>
    %6 = arith.maximumf %4, %5 : vector<2x8x1xf32>
    %cst_5 = arith.constant dense<0xFF800000> : vector<2x1xf32>
    %7 = vector.multi_reduction <maximumf>, %6, %cst_5 [1] : vector<2x8x1xf32> to vector<2x1xf32>
    %8 = vector.shape_cast %7 : vector<2x1xf32> to vector<2x1x1xf32>
    %9 = vector.broadcast %8 : vector<2x1x1xf32> to vector<2x8x1xf32>
    %10 = arith.subf %6, %9 : vector<2x8x1xf32>
    %11 = math.exp %10 : vector<2x8x1xf32>
    %cst_6 = arith.constant dense<0.000000e+00> : vector<2x1xf32>
    %12 = vector.multi_reduction <add>, %11, %cst_6 [1] : vector<2x8x1xf32> to vector<2x1xf32>
    %13 = vector.shape_cast %12 : vector<2x1xf32> to vector<2x1x1xf32>
    %14 = vector.broadcast %11 : vector<2x8x1xf32> to vector<2x8x128xf32>
    %15 = arith.mulf %14, %0 : vector<2x8x128xf32>
    %cst_7 = arith.constant dense<0.000000e+00> : vector<2x128xf32>
    %16 = vector.multi_reduction <add>, %15, %cst_7 [1] : vector<2x8x128xf32> to vector<2x128xf32>
    %17 = tpu.reciprocal %13 : vector<2x1x1xf32> -> vector<2x1x1xf32>
    %18 = vector.shape_cast %17 : vector<2x1x1xf32> to vector<2x1xf32>
    %19 = vector.broadcast %18 : vector<2x1xf32> to vector<2x128xf32>
    %20 = arith.mulf %16, %19 : vector<2x128xf32>
    %c0_8 = arith.constant 0 : index
    %c0_9 = arith.constant 0 : index
    %21 = vector.load %arg3[%c0_8, %c0_9] : memref<2x128xf32, #tpu.memory_space<vmem>>, vector<2x128xf32>
    tpu.vector_store %arg3[%c0_8, %c0_9], %20 {strides = array<i32>} : memref<2x128xf32, #tpu.memory_space<vmem>>, vector<2x128xf32>,
    return
  }
  func.func @transform_0(%arg0: i32) -> (i32, i32, i32) {
    %c0_i32 = arith.constant 0 : i32
    %c0_i32_0 = arith.constant 0 : i32
    %c0_i32_1 = arith.constant 0 : i32
    return %arg0, %c0_i32, %c0_i32_0 : i32, i32, i32
  }
  func.func @transform_1(%arg0: i32) -> (i32, i32) {
    %c0_i32 = arith.constant 0 : i32
    %c0_i32_0 = arith.constant 0 : i32
    %c0_i32_1 = arith.constant 0 : i32
    return %c0_i32, %c0_i32_0 : i32, i32
  }
  func.func @transform_2(%arg0: i32) -> (i32, i32) {
    %c0_i32 = arith.constant 0 : i32
    %c0_i32_0 = arith.constant 0 : i32
    return %arg0, %c0_i32 : i32, i32
  }
}

</mosaic_0001>

<bundles_post_ra>
// kernel: tpu_custom_call.1
= control target key start
LH: loop header
LB: loop body
LE: loop exit
PB: predicated region body
PF: predicated region fallthrough
CT: control target
= control target key end

     0   :  { %s887_s0 = inlined_call_operand.vmem [shape: f32[2,8,128], index: 0, kind: input, shape index: {}]   ;;  %s888_s1 = inlined_call_operand.vmem [shape: f32[128,1], index: 1, kind: input, shape index: {}]   ;;  %s889_s2 = inlined_call_operand.hbm [shape: f32[2,128], index: 2, kind: output, shape index: {}]  }
   0x1   :  { %v29_v0 = vld [vmem:[%s888_s1 + $0x78] sm:$0xff]  ;;  %v28_v1 = vld [vmem:[%s888_s1 + $0x70] sm:$0xff]  ;;  %v27_v2 = vld [vmem:[%s888_s1 + $0x68] sm:$0xff] }
   0x2   :  { %v621_v3 = vand.u32 4294901760, %v29_v0  ;;  %v623_v4 = vand.u32 4294901760, %v28_v1  ;;  %v625_v5 = vand.u32 4294901760, %v27_v2  ;;  %v26_v6 = vld [vmem:[%s888_s1 + $0x60] sm:$0xff]  ;;  %v25_v7 = vld [vmem:[%s888_s1 + $0x58] sm:$0xff]  ;;  %v24_v8 = vld [vmem:[%s888_s1 + $0x50] sm:$0xff] }
   0x3   :  { %v636_v9 = vand.u32 4294901760, %v26_v6  ;;  %v638_v10 = vand.u32 4294901760, %v25_v7  ;;  %v640_v11 = vand.u32 4294901760, %v24_v8  ;;  %v23_v12 = vld [vmem:[%s888_s1 + $0x48] sm:$0xff]  ;;  %v22_v13 = vld [vmem:[%s888_s1 + $0x40] sm:$0xff]  ;;  %v21_v18 = vld [vmem:[%s888_s1 + $0x38] sm:$0xff] }
   0x4   :  { %31 = vmatpush.msra.mxu0 %v621_v3  ;;  %v80_v14 = vsub.f32 %v29_v0, %v621_v3  ;;  %v86_v15 = vsub.f32 %v28_v1, %v623_v4  ;;  %244 = vmatpush.msra.mxu3 %v621_v3  ;;  %v92_v16 = vsub.f32 %v27_v2, %v625_v5  ;;  %v653_v17 = vand.u32 4294901760, %v23_v12  ;;  %v20_v26 = vld [vmem:[%s888_s1 + $0x30] sm:$0xff] }
   0x5   :  { %v98_v19 = vsub.f32 %v26_v6, %v636_v9  ;;  %v104_v20 = vsub.f32 %v25_v7, %v638_v10  ;;  %v660_v21 = vand.u32 4294901760, %v22_v13  ;;  %v110_v25 = vsub.f32 %v24_v8, %v640_v11 }
   0x6   :  { %33 = vmatpush.msra.mxu0 %v623_v4  ;;  %186 = vmatpush.msra.mxu2 %v80_v14  ;;  %v663_v22 = vand.u32 4294901760, %v80_v14  ;;  %v665_v23 = vand.u32 4294901760, %v86_v15  ;;  %v667_v24 = vand.u32 4294901760, %v92_v16 }
   0x7   :  { %7 = vsyncpa [#allocation3], 0  ;;  %246 = vmatpush.msra.mxu3 %v623_v4  ;;  %v674_v27 = vand.u32 4294901760, %v98_v19  ;;  %v116_v28 = vsub.f32 %v23_v12, %v653_v17  ;;  %v677_v29 = vand.u32 4294901760, %v21_v18  ;;  %v683_v33 = vand.u32 4294901760, %v104_v20  ;;  %v19_v36 = vld [vmem:[%s888_s1 + $0x28] sm:$0xff] }
   0x8   :  { %35 = vmatpush.msra.mxu0 %v625_v5  ;;  %189 = vmatpush.msra.mxu2 %v86_v15  ;;  %v82_v30 = vsub.f32 %v80_v14, %v663_v22  ;;  %v88_v31 = vsub.f32 %v86_v15, %v665_v23  ;;  %v94_v32 = vsub.f32 %v92_v16, %v667_v24  ;;  %v687_v35 = vand.u32 4294901760, %v20_v26  ;;  %v18_v42 = vld [vmem:[%s888_s1 + $0x20] sm:$0xff]  ;;  %v17_v48 = vld [vmem:[%s888_s1 + $0x18] sm:$0xff]  ;;  %v16_v54 = vld [vmem:[%s888_s1 + $0x10] sm:$0xff]  ;;  %s516_s19 = sshll.u32 %s889_s2, 4  ;;  %s517_s19 = int_to_ptr.hbm [resolvable:$true] %s516_s19 }
   0x9   :  { %248 = vmatpush.msra.mxu3 %v625_v5  ;;  %v122_v34 = vsub.f32 %v22_v13, %v660_v21  ;;  %v100_v39 = vsub.f32 %v98_v19, %v674_v27  ;;  %v694_v40 = vand.u32 4294901760, %v110_v25  ;;  %v697_v41 = vand.u32 4294901760, %v116_v28  ;;  %v15_v60 = vld [vmem:[%s888_s1 + $0x8] sm:$0xff]  ;;  %v14_v2 = vld [vmem:[%s888_s1] sm:$0xff] }
   0xa   :  { %37 = vmatpush.msra.mxu0 %v636_v9  ;;  %192 = vmatpush.msra.mxu2 %v92_v16  ;;  %v83_v37 = vand.u32 4294901760, %v82_v30  ;;  %v89_v38 = vand.u32 4294901760, %v88_v31  ;;  %v95_v43 = vand.u32 4294901760, %v94_v32  ;;  %v106_v44 = vsub.f32 %v104_v20, %v683_v33 }
   0xb   :  { %250 = vmatpush.msra.mxu3 %v636_v9  ;;  %v128_v45 = vsub.f32 %v21_v18, %v677_v29  ;;  %v705_v46 = vand.u32 4294901760, %v19_v36  ;;  %v708_v47 = vand.u32 4294901760, %v122_v34  ;;  %v101_v49 = vand.u32 4294901760, %v100_v39 }
   0xc   :  { %39 = vmatpush.msra.mxu0 %v638_v10  ;;  %84 = vmatpush.msra.mxu1 %v83_v37  ;;  %v112_v50 = vsub.f32 %v110_v25, %v694_v40  ;;  %v134_v51 = vsub.f32 %v20_v26, %v687_v35  ;;  %v716_v52 = vand.u32 4294901760, %v18_v42  ;;  %v118_v53 = vsub.f32 %v116_v28, %v697_v41 }
   0xd   :  { %195 = vmatpush.msra.mxu2 %v98_v19  ;;  %252 = vmatpush.msra.mxu3 %v638_v10  ;;  %v107_v55 = vand.u32 4294901760, %v106_v44  ;;  %v140_v56 = vsub.f32 %v19_v36, %v705_v46  ;;  %v725_v57 = vand.u32 4294901760, %v17_v48  ;;  %v727_v58 = vand.u32 4294901760, %v128_v45 }
   0xe   :  { %41 = vmatpush.msra.mxu0 %v640_v11  ;;  %90 = vmatpush.msra.mxu1 %v89_v38  ;;  %v124_v59 = vsub.f32 %v122_v34, %v708_v47  ;;  %v113_v61 = vand.u32 4294901760, %v112_v50  ;;  %v146_v62 = vsub.f32 %v18_v42, %v716_v52  ;;  %v736_v63 = vand.u32 4294901760, %v16_v54  ;;  %v779_v38 = vld [vmem:[%s887_s0] sm:$0xff] }
   0xf   :  { %198 = vmatpush.msra.mxu2 %v104_v20  ;;  %254 = vmatpush.msra.mxu3 %v640_v11  ;;  %v738_v0 = vand.u32 4294901760, %v134_v51  ;;  %v119_v1 = vand.u32 4294901760, %v118_v53  ;;  %v130_v6 = vsub.f32 %v128_v45, %v727_v58  ;;  %v152_v7 = vsub.f32 %v17_v48, %v725_v57 }
  0x10   :  { %43 = vmatpush.msra.mxu0 %v653_v17  ;;  %96 = vmatpush.msra.mxu1 %v95_v43  ;;  %v747_v8 = vand.u32 4294901760, %v15_v60  ;;  %v749_v12 = vand.u32 4294901760, %v140_v56  ;;  %v125_v13 = vand.u32 4294901760, %v124_v59  ;;  %v158_v15 = vsub.f32 %v16_v54, %v736_v63 }
  0x11   :  { %201 = vmatpush.msra.mxu2 %v110_v25  ;;  %256 = vmatpush.msra.mxu3 %v653_v17  ;;  %v136_v14 = vsub.f32 %v134_v51, %v738_v0  ;;  %v755_v16 = vand.u32 4294901760, %v14_v2  ;;  %v757_v18 = vand.u32 4294901760, %v146_v62  ;;  %v131_v19 = vand.u32 4294901760, %v130_v6 }
  0x12   :  { %45 = vmatpush.msra.mxu0 %v660_v21  ;;  %102 = vmatpush.msra.mxu1 %v101_v49  ;;  %v142_v20 = vsub.f32 %v140_v56, %v749_v12  ;;  %v164_v25 = vsub.f32 %v15_v60, %v747_v8  ;;  %v763_v26 = vand.u32 4294901760, %v152_v7  ;;  %v769_v32 = vand.u32 4294901760, %v158_v15 }
  0x13   :  { %204 = vmatpush.msra.mxu2 %v116_v28  ;;  %258 = vmatpush.msra.mxu3 %v660_v21  ;;  %v137_v28 = vand.u32 4294901760, %v136_v14  ;;  %v148_v30 = vsub.f32 %v146_v62, %v757_v18  ;;  %v170_v31 = vsub.f32 %v14_v2, %v755_v16  ;;  %v788_v44 = vand.u32 4294901760, %v779_v38 }
  0x14   :  { %47 = vmatpush.msra.mxu0 %v677_v29  ;;  %108 = vmatpush.msra.mxu1 %v107_v55  ;;  %v154_v36 = vsub.f32 %v152_v7, %v763_v26  ;;  %v774_v37 = vand.u32 4294901760, %v164_v25  ;;  %v160_v42 = vsub.f32 %v158_v15, %v769_v32  ;;  %v804_v55 = vld [vmem:[%s887_s0 + $0x8] sm:$0xff]  ;;  %vm404_vm0 = vcmask 7168   ;;  %s596_s0 = smov [#allocation2]  }
  0x15   :  { %207 = vmatpush.msra.mxu2 %v122_v34  ;;  %260 = vmatpush.msra.mxu3 %v677_v29  ;;  %v143_v34 = vand.u32 4294901760, %v142_v20  ;;  %v149_v39 = vand.u32 4294901760, %v148_v30  ;;  %v784_v43 = vand.u32 4294901760, %v170_v31  ;;  %s514_s16 = sshll.u32 %s596_s0, 4  ;;  %vm505_vm9 = vcmask 1041409   ;;  %s515_s16 = int_to_ptr.vmem [resolvable:$true] %s514_s16 }
  0x16   :  { %49 = vmatpush.msra.mxu0 %v687_v35  ;;  %114 = vmatpush.msra.mxu1 %v113_v61  ;;  %v166_v48 = vsub.f32 %v164_v25, %v774_v37  ;;  %v161_v49 = vand.u32 4294901760, %v160_v42 }
  0x17   :  { %210 = vmatpush.msra.mxu2 %v128_v45  ;;  %262 = vmatpush.msra.mxu3 %v687_v35  ;;  %v155_v45 = vand.u32 4294901760, %v154_v36  ;;  %v172_v50 = vsub.f32 %v170_v31, %v784_v43 }
  0x18   :  { %51 = vmatpush.msra.mxu0 %v705_v46  ;;  %120 = vmatpush.msra.mxu1 %v119_v1  ;;  %v167_v53 = vand.u32 4294901760, %v166_v48 }
  0x19   :  { %213 = vmatpush.msra.mxu2 %v134_v51  ;;  %264 = vmatpush.msra.mxu3 %v705_v46  ;;  %v63_v51 = vsub.f32 %v779_v38, %v788_v44  ;;  %v173_v54 = vand.u32 4294901760, %v172_v50 }
  0x1a   :  { %53 = vmatpush.msra.mxu0 %v716_v52  ;;  %126 = vmatpush.msra.mxu1 %v125_v13 }
  0x1b   :  { %216 = vmatpush.msra.mxu2 %v140_v56  ;;  %266 = vmatpush.msra.mxu3 %v716_v52  ;;  %v64_v56 = vand.u32 4294901760, %v63_v51 }
  0x1c   :  { %55 = vmatpush.msra.mxu0 %v725_v57  ;;  %132 = vmatpush.msra.mxu1 %v131_v19 }
  0x1d   :  { %219 = vmatpush.msra.mxu2 %v146_v62  ;;  %268 = vmatpush.msra.mxu3 %v725_v57  ;;  %v65_v59 = vsub.f32 %v63_v51, %v64_v56 }
  0x1e   :  { %57 = vmatpush.msra.mxu0 %v736_v63  ;;  %138 = vmatpush.msra.mxu1 %v137_v28 }
  0x1f   :  { %222 = vmatpush.msra.mxu2 %v152_v7  ;;  %270 = vmatpush.msra.mxu3 %v736_v63 }
  0x20   :  { %59 = vmatpush.msra.mxu0 %v747_v8  ;;  %144 = vmatpush.msra.mxu1 %v143_v34 }
  0x21   :  { %225 = vmatpush.msra.mxu2 %v158_v15  ;;  %272 = vmatpush.msra.mxu3 %v747_v8 }
  0x22   :  { %61 = vmatpush.msra.mxu0 %v755_v16  ;;  %150 = vmatpush.msra.mxu1 %v149_v39 }
  0x23   :  { %228 = vmatpush.msra.mxu2 %v164_v25  ;;  %274 = vmatpush.msra.mxu3 %v755_v16 }
  0x24   :  { %291 = vmatpush.msrb.mxu0 %v663_v22  ;;  %156 = vmatpush.msra.mxu1 %v155_v45 }
  0x25   :  { %231 = vmatpush.msra.mxu2 %v170_v31  ;;  %541 = vmatpush.msrb.mxu3 %v621_v3 }
  0x26   :  { %295 = vmatpush.msrb.mxu0 %v665_v23  ;;  %162 = vmatpush.msra.mxu1 %v161_v49 }
  0x27   :  { %525 = vmatpush.msrb.mxu2 %v663_v22  ;;  %542 = vmatpush.msrb.mxu3 %v623_v4  ;;  %v812_v22 = vand.u32 4294901760, %v804_v55 }
  0x28   :  { %299 = vmatpush.msrb.mxu0 %v667_v24  ;;  %168 = vmatpush.msra.mxu1 %v167_v53 }
  0x29   :  { %526 = vmatpush.msrb.mxu2 %v665_v23  ;;  %543 = vmatpush.msrb.mxu3 %v625_v5  ;;  %v71_v23 = vsub.f32 %v804_v55, %v812_v22 }
  0x2a   :  { %303 = vmatpush.msrb.mxu0 %v674_v27  ;;  %174 = vmatpush.msra.mxu1 %v173_v54 }
  0x2b   :  { %527 = vmatpush.msrb.mxu2 %v667_v24  ;;  %544 = vmatpush.msrb.mxu3 %v636_v9 }
  0x2c   :  { %307 = vmatpush.msrb.mxu0 %v683_v33  ;;  %362 = vmatpush.msrb.mxu1 %v621_v3  ;;  %v66_v3 = vand.u32 4294901760, %v65_v59 }
  0x2d   :  { %528 = vmatpush.msrb.mxu2 %v674_v27  ;;  %545 = vmatpush.msrb.mxu3 %v638_v10 }
  0x2e   :  { %311 = vmatpush.msrb.mxu0 %v694_v40  ;;  %364 = vmatpush.msrb.mxu1 %v623_v4  ;;  %v72_v4 = vand.u32 4294901760, %v71_v23 }
  0x2f   :  { %529 = vmatpush.msrb.mxu2 %v683_v33  ;;  %546 = vmatpush.msrb.mxu3 %v640_v11 }
  0x30   :  { %315 = vmatpush.msrb.mxu0 %v697_v41  ;;  %366 = vmatpush.msrb.mxu1 %v625_v5  ;;  %v73_v5 = vsub.f32 %v71_v23, %v72_v4 }
  0x31   :  { %530 = vmatpush.msrb.mxu2 %v694_v40  ;;  %67 = vmatmul.f32.vlgmr.msra.gmra.mxu0 %v66_v3 }
  0x32   :  { %319 = vmatpush.msrb.mxu0 %v708_v47  ;;  %368 = vmatpush.msrb.mxu1 %v636_v9  ;;  %v74_v9 = vand.u32 4294901760, %v73_v5 }
  0x33   :  { %531 = vmatpush.msrb.mxu2 %v697_v41  ;;  %547 = vmatpush.msrb.mxu3 %v653_v17 }
  0x34   :  { %370 = vmatpush.msrb.mxu1 %v638_v10  ;;  %323 = vmatpush.msrb.mxu0 %v727_v58 }
  0x35   :  { %532 = vmatpush.msrb.mxu2 %v708_v47  ;;  %548 = vmatpush.msrb.mxu3 %v660_v21 }
  0x36   :  { %234 = vmatmul.f32.vlgmr.msra.gmra.mxu2 %v63_v51  ;;  %327 = vmatpush.msrb.mxu0 %v738_v0 }
  0x37   :  { %533 = vmatpush.msrb.mxu2 %v727_v58  ;;  %372 = vmatpush.msrb.mxu1 %v640_v11 }
  0x38   :  { %278 = vmatmul.f32.vlgmr.msra.gmra.mxu3 %v64_v56  ;;  %331 = vmatpush.msrb.mxu0 %v749_v12 }
  0x39   :  { %534 = vmatpush.msrb.mxu2 %v738_v0  ;;  %374 = vmatpush.msrb.mxu1 %v653_v17 }
  0x3a   :  { %549 = vmatpush.msrb.mxu3 %v677_v29  ;;  %176 = vmatmul.f32.vlgmr.msra.gmra.mxu1 %v788_v44 }
  0x3b   :  { %535 = vmatpush.msrb.mxu2 %v749_v12  ;;  %335 = vmatpush.msrb.mxu0 %v757_v18 }
  0x3c   :  { %376 = vmatpush.msrb.mxu1 %v660_v21  ;;  %550 = vmatpush.msrb.mxu3 %v687_v35 }
  0x3d   :  { %75 = vmatmul.f32.gmra.mxu0 %v74_v9  ;;  %536 = vmatpush.msrb.mxu2 %v757_v18 }
  0x3e   :  { %339 = vmatpush.msrb.mxu0 %v763_v26  ;;  %378 = vmatpush.msrb.mxu1 %v677_v29 }
  0x3f   :  { %551 = vmatpush.msrb.mxu3 %v705_v46  ;;  %239 = vmatmul.f32.gmra.mxu2 %v71_v23 }
  0x40   :  { %537 = vmatpush.msrb.mxu2 %v763_v26  ;;  %343 = vmatpush.msrb.mxu0 %v769_v32 }
  0x41   :  { %380 = vmatpush.msrb.mxu1 %v687_v35  ;;  %552 = vmatpush.msrb.mxu3 %v716_v52 }
  0x42   :  { %284 = vmatmul.f32.gmra.mxu3 %v72_v4  ;;  %538 = vmatpush.msrb.mxu2 %v769_v32 }
  0x43   :  { %347 = vmatpush.msrb.mxu0 %v774_v37  ;;  %382 = vmatpush.msrb.mxu1 %v705_v46 }
  0x44   :  { %553 = vmatpush.msrb.mxu3 %v725_v57  ;;  %180 = vmatmul.f32.gmra.mxu1 %v812_v22 }
  0x45   :  { %539 = vmatpush.msrb.mxu2 %v774_v37  ;;  %351 = vmatpush.msrb.mxu0 %v784_v43 }
  0x46   :  { %384 = vmatpush.msrb.mxu1 %v716_v52  ;;  %554 = vmatpush.msrb.mxu3 %v736_v63  ;;  %v595_v52 = vmov 0  }
  0x47   :  { %353 = vmatmul.f32.vlgmr.msrb.gmra.mxu0 %v788_v44  ;;  %540 = vmatpush.msrb.mxu2 %v784_v43 }
  0x48   :  { %386 = vmatpush.msrb.mxu1 %v725_v57  ;;  %555 = vmatpush.msrb.mxu3 %v747_v8 }
  0x49   :  { %357 = vmatmul.f32.vlgmr.msrb.gmra.mxu2 %v812_v22  ;;  %559 = vset.pattern.permute.xlu0 %v595_v52 }
  0x4a   :  { %388 = vmatpush.msrb.mxu1 %v736_v63  ;;  %556 = vmatpush.msrb.mxu3 %v755_v16 }
  0x4b   :  { %398 = vmatmul.f32.vlgmr.msrb.gmra.mxu3 %v812_v22  ;;  %560 = vset.pattern.permute.xlu1 %v595_v52 }
  0x4c   :  { %390 = vmatpush.msrb.mxu1 %v747_v8 }
  0x4e   :  { %392 = vmatpush.msrb.mxu1 %v755_v16 }
  0x4f   :  { %394 = vmatmul.f32.vlgmr.msrb.gmra.mxu1 %v788_v44 }
  0xae   :  { %v68_v10 = vpop.f32.mrf.mxu0 }
  0xb7   :  { %v177_v11 = vpop.f32.mrf.mxu1 }
  0xb8   :  { %v178_v27 = vadd.f32 %v177_v11, %v68_v10 }
  0xb9   :  { %v235_v17 = vpop.f32.mrf.mxu2 }
  0xba   :  { %v76_v24 = vpop.f32.mrf.mxu0  ;;  %v236_v40 = vadd.f32 %v235_v17, %v178_v27 }
  0xbb   :  { %v279_v21 = vpop.f32.mrf.mxu3 }
  0xbc   :  { %v280_v57 = vadd.f32 %v279_v21, %v236_v40 }
  0xc1   :  { %v181_v29 = vpop.f32.mrf.mxu1 }
  0xc2   :  { %v240_v33 = vpop.f32.mrf.mxu2  ;;  %v182_v35 = vadd.f32 %v181_v29, %v76_v24 }
  0xc4   :  { %v241_v46 = vadd.f32 %v240_v33, %v182_v35  ;;  %v354_v47 = vpop.f32.mrf.mxu0 }
  0xc5   :  { %v285_v41 = vpop.f32.mrf.mxu3  ;;  %v355_v58 = vadd.f32 %v354_v47, %v280_v57 }
  0xc6   :  { %v286_v60 = vadd.f32 %v285_v41, %v241_v46 }
  0xcc   :  { %v358_v61 = vpop.f32.mrf.mxu2  ;;  %v395_v62 = vpop.f32.mrf.mxu1 }
  0xcd   :  { %v359_v63 = vadd.f32 %v358_v61, %v286_v60  ;;  %v396_v0 = vadd.f32 %v395_v62, %v355_v58 }
  0xce   :  { %v399_v1 = vpop.f32.mrf.mxu3 }
  0xcf   :  { %v402_v2 = vmax.f32 %v396_v0, 0.0  ;;  %v400_v6 = vadd.f32 %v399_v1, %v359_v63 }
  0xd1   :  { %v405_v7 = vsel %vm404_vm0, %v402_v2, -inf  ;;  %v403_v8 = vmax.f32 %v400_v6, 0.0 }
  0xd2   :  { %v406_v12 = vrot.slane %v405_v7, 4 }
  0xd3   :  { %v412_v13 = vsel %vm404_vm0, %v403_v8, -inf }
  0xd4   :  { %v407_v14 = vmax.f32 %v405_v7, %v406_v12  ;;  %v413_v15 = vrot.slane %v412_v13, 4 }
  0xd6   :  { %v408_v16 = vrot.slane %v407_v14, 2  ;;  %v414_v18 = vmax.f32 %v412_v13, %v413_v15 }
  0xd8   :  { %v409_v19 = vmax.f32 %v407_v14, %v408_v16  ;;  %v415_v20 = vrot.slane %v414_v18, 2 }
  0xda   :  { %v410_v25 = vrot.slane %v409_v19, 1  ;;  %v416_v26 = vmax.f32 %v414_v18, %v415_v20 }
  0xdc   :  { %v411_v28 = vmax.f32 %v409_v19, %v410_v25  ;;  %v417_v30 = vrot.slane %v416_v26, 1 }
  0xde   :  { %v419_v31 = vsub.f32 %v402_v2, %v411_v28  ;;  %v418_v32 = vmax.f32 %v416_v26, %v417_v30 }
  0xe0   :  { %v421_v34 = vmul.f32 1.442695, %v419_v31  ;;  %v420_v36 = vsub.f32 %v403_v8, %v418_v32 }
  0xe2   :  { %561 = vpow2.f32 %v421_v34  ;;  %v423_v37 = vmul.f32 1.442695, %v420_v36 }
  0xe4   :  { %563 = vpow2.f32 %v423_v37 }
  0xe8   :  { %v562_v39 = vpop.eup %561 }
  0xe9   :  { %v425_v42 = vsel %vm404_vm0, %v562_v39, 0.0  ;;  %441 = vperm.xlu0 %559, %v562_v39  }
  0xea   :  { %v564_v43 = vpop.eup %563  ;;  %v426_v44 = vrot.slane %v425_v42, 4 }
  0xeb   :  { %v432_v45 = vsel %vm404_vm0, %v564_v43, 0.0 }
  0xec   :  { %v427_v48 = vadd.f32 %v426_v44, %v425_v42  ;;  %v433_v49 = vrot.slane %v432_v45, 4 }
  0xee   :  { %v428_v50 = vrot.slane %v427_v48, 2  ;;  %v434_v51 = vadd.f32 %v433_v49, %v432_v45 }
  0xf0   :  { %v429_v53 = vadd.f32 %v428_v50, %v427_v48  ;;  %v435_v54 = vrot.slane %v434_v51, 2 }
  0xf1   :  { %446 = vperm.xlu0 %559, %v564_v43  }
  0xf2   :  { %v430_v56 = vrot.slane %v429_v53, 1  ;;  %v436_v22 = vadd.f32 %v435_v54, %v434_v51 }
  0xf4   :  { %v437_v59 = vrot.slane %v436_v22, 1  ;;  %v431_v23 = vadd.f32 %v430_v56, %v429_v53 }
  0xf6   :  { %v438_v3 = vadd.f32 %v437_v59, %v436_v22  ;;  %565 = vrcp.f32 %v431_v23  ;;  %v474_v17 = vand.u32 2147483648, %v431_v23  ;;  %v472_v24 = vand.u32 2147483647, %v431_v23 }
  0xf7   :  { %vm468_vm2 = vweird.f32 %v431_v23 }
  0xf8   :  { %567 = vrcp.f32 %v438_v3  ;;  %v475_v35 = vor.u32 1.1754944e-38, %v474_v17  ;;  %vm473_vm4 = vcmp.eq.f32.partialorder %v472_v24, 8.507059e+37  ;;  %v488_v47 = vand.u32 2147483648, %v438_v3 }
  0xf9   :  { %vm482_vm6 = vweird.f32 %v438_v3  ;;  %v486_v52 = vand.u32 2147483647, %v438_v3 }
  0xfa   :  { %v489_v58 = vor.u32 1.1754944e-38, %v488_v47 }
  0xfb   :  { %vm487_vm8 = vcmp.eq.f32.partialorder %v486_v52, 8.507059e+37 }
  0xfc   :  { %v566_v4 = vpop.eup %565 }
  0xfd   :  { %v464_v5 = vmul.f32 %v566_v4, %v431_v23  ;;  %vm469_vm1 = vweird.f32 %v566_v4 }
  0xfe   :  { %v568_v9 = vpop.eup %567  ;;  %vm470_vm3 = vmor %vm468_vm2, %vm469_vm1 }
  0xff   :  { %v465_v10 = vsub.f32 1.0, %v464_v5  ;;  %v478_v11 = vmul.f32 %v568_v9, %v438_v3  ;;  %vm483_vm5 = vweird.f32 %v568_v9 }
 0x100   :  { %vm484_vm7 = vmor %vm482_vm6, %vm483_vm5 }
 0x101   :  { %v466_v21 = vmul.f32 %v566_v4, %v465_v10  ;;  %v479_v27 = vsub.f32 1.0, %v478_v11 }
 0x103   :  { %v467_v29 = vadd.f32 %v566_v4, %v466_v21  ;;  %v480_v33 = vmul.f32 %v568_v9, %v479_v27 }
 0x105   :  { %v471_v40 = vsel %vm470_vm3, %v566_v4, %v467_v29  ;;  %v481_v46 = vadd.f32 %v568_v9, %v480_v33 }
 0x106   :  { %v476_v41 = vsel %vm473_vm4, %v475_v35, %v471_v40 }
 0x107   :  { %493 = vperm.xlu1 %560, %v476_v41   ;;  %v485_v57 = vsel %vm484_vm7, %v568_v9, %v481_v46 }
 0x108   :  { %v490_v60 = vsel %vm487_vm8, %v489_v58, %v485_v57 }
 0x10f   :  { %498 = vperm.xlu1 %560, %v490_v60  }
 0x15b   :  { %v442_v61 = vpop.permute.xlu0 %441 }
 0x15c   :  { %v449_v63 = vmul.f32 %v442_v61, %v779_v38 }
 0x15e   :  { %v451_v1 = vrot.slane %v449_v63, 4 }
 0x160   :  { %v452_v6 = vadd.f32 %v451_v1, %v449_v63 }
 0x162   :  { %v453_v8 = vrot.slane %v452_v6, 2 }
 0x163   :  { %v447_v62 = vpop.permute.xlu0 %446 }
 0x164   :  { %v450_v0 = vmul.f32 %v447_v62, %v804_v55  ;;  %v454_v13 = vadd.f32 %v453_v8, %v452_v6 }
 0x166   :  { %v457_v2 = vrot.slane %v450_v0, 4  ;;  %v455_v16 = vrot.slane %v454_v13, 1 }
 0x168   :  { %v458_v7 = vadd.f32 %v457_v2, %v450_v0  ;;  %v456_v19 = vadd.f32 %v455_v16, %v454_v13 }
 0x16a   :  { %v459_v12 = vrot.slane %v458_v7, 2 }
 0x16c   :  { %v460_v14 = vadd.f32 %v459_v12, %v458_v7 }
 0x16e   :  { %v461_v18 = vrot.slane %v460_v14, 1 }
 0x170   :  { %v462_v20 = vadd.f32 %v461_v18, %v460_v14 }
 0x179   :  { %v494_v15 = vpop.permute.xlu1 %493 }
 0x17a   :  { %v501_v55 = vmul.f32 %v494_v15, %v456_v19 }
 0x181   :  { %v499_v38 = vpop.permute.xlu1 %498 }
 0x182   :  { %v502_v25 = vmul.f32 %v499_v38, %v462_v20 }
 0x184   :  { %v506_v26 = vsel %vm505_vm9, %v502_v25, %v501_v55 }
 0x185   :  { %508 = vst [vmem:[#allocation2] sm:$0x3] %v506_v26 }
 0x186   :  { %519 = dma.vmem_to_hbm [thread:$0]  %s515_s16, 32, %s517_s19, [#allocation3]  }
 0x187   :  { %593 = dma.done.wait [#allocation3], 32  }
 0x188   :  { %594 = vsyncadd [#allocation3], 4294967264 }
 0x189   :  { %524 = vsyncpa [#allocation3], 1 }

</bundles_post_ra>
